<compile_context>
chip_gen: v7x
topology: tpu7x:2x2x1
jax: 0.10.0
libtpu: 0.0.40
codegen_flags: <defaults>
</compile_context>

<pallas_src>
import jax
import jax.numpy as jnp
from jax.experimental import pallas as pl
from jax.experimental.pallas import tpu as pltpu


def _round_up(x: int, m: int) -> int:
    return ((x + m - 1) // m) * m


def _pick_tile(dim: int, preferred: int, align: int) -> int:
    """Largest tile <= `preferred`, multiple of `align`, dividing the aligned dim."""
    aligned = _round_up(dim, align)
    if aligned <= preferred:
        return aligned
    cand = (preferred // align) * align
    while cand > align:
        if aligned % cand == 0:
            return cand
        cand -= align
    return align


def _make_cast_linear_kernel(compute_dtype):
    def kernel(x_ref, w_ref, b_ref, o_ref, acc_ref):
        k = pl.program_id(2)

        @pl.when(k == 0)
        def _():
            acc_ref[...] = jnp.zeros_like(acc_ref)

        # --- in_cast: cast tensor inputs before the underlying Linear ---
        x = x_ref[...].astype(compute_dtype)
        w = w_ref[...].astype(compute_dtype)

        # --- underlying module: nn.Linear matmul on the MXU, f32 accumulate ---
        acc_ref[...] += jnp.dot(x, w, preferred_element_type=jnp.float32)

        # --- epilogue on last K step: bias add + out_cast, single HBM store ---
        @pl.when(k == pl.num_programs(2) - 1)
        def _():
            y = acc_ref[...] + b_ref[...].astype(jnp.float32)
            o_ref[...] = y.astype(o_ref.dtype)

    return kernel


def cast_linear(x, w, b, *, in_cast=jnp.float32, out_cast=jnp.bfloat16,
                tm=256, tn=512, tk=512):
    """CastModule(nn.Linear(H_in, H_out), in_cast, out_cast) forward.

    x: [R, H_in]     any float dtype; cast to `in_cast` inside the kernel
    w: [H_in, H_out] f32 weight (transposed vs. PyTorch's [out, in])
    b: [H_out]       f32 bias
    in_cast:  compute dtype of the underlying Linear (f32 = strict CastModule
              semantics; bf16 = native-MXU fast path, slightly lower precision)
    out_cast: output dtype (None -> keep compute dtype, like CastModule)
    returns: [R, H_out] in `out_cast`
    """
    R, H_in = x.shape
    H_out = w.shape[1]
    out_dtype = out_cast if out_cast is not None else in_cast

    # Tiles: largest aligned divisors of the 128-padded dims (<= preferred).
    tm = _pick_tile(R, tm, 8)
    tk = _pick_tile(H_in, tk, 128)
    tn = _pick_tile(H_out, tn, 128)

    # Zero-pad to tile multiples (padding contributes 0 to the contraction and
    # padded output rows/cols are sliced off below).  For (8,128)-aligned
    # problems this is a no-op.
    Rp, Kp, Np = _round_up(R, tm), _round_up(H_in, tk), _round_up(H_out, tn)
    if (Rp, Kp) != (R, H_in):
        x = jnp.pad(x, ((0, Rp - R), (0, Kp - H_in)))
    if (Kp, Np) != (H_in, H_out):
        w = jnp.pad(w, ((0, Kp - H_in), (0, Np - H_out)))
    b2d = b.reshape(1, H_out)
    if Np != H_out:
        b2d = jnp.pad(b2d, ((0, 0), (0, Np - H_out)))

    grid = (Rp // tm, Np // tn, Kp // tk)

    cost = pl.CostEstimate(
        flops=2 * R * H_in * H_out,
        transcendentals=0,
        bytes_accessed=int(x.nbytes + w.nbytes + b2d.nbytes
                           + R * H_out * jnp.dtype(out_dtype).itemsize),
    )

    out = pl.pallas_call(
        _make_cast_linear_kernel(in_cast),
        out_shape=jax.ShapeDtypeStruct((Rp, Np), out_dtype),
        grid_spec=pltpu.PrefetchScalarGridSpec(
            num_scalar_prefetch=0,
            grid=grid,
            in_specs=[
                pl.BlockSpec((tm, tk), lambda i, j, k: (i, k)),   # x tile
                pl.BlockSpec((tk, tn), lambda i, j, k: (k, j)),   # w tile
                pl.BlockSpec((1, tn), lambda i, j, k: (0, j)),    # bias tile
            ],
            out_specs=pl.BlockSpec((tm, tn), lambda i, j, k: (i, j)),
            scratch_shapes=[pltpu.VMEM((tm, tn), jnp.float32)],
        ),
        compiler_params=pltpu.CompilerParams(
            dimension_semantics=("parallel", "parallel", "arbitrary"),
            vmem_limit_bytes=32 * 1024 * 1024,
        ),
        cost_estimate=cost,
    )(x, w, b2d)

    if (Rp, Np) != (R, H_out):
        out = out[:R, :H_out]
    return out


if __name__ == "__main__":
    # Small shapes consistent with the forward: batch=2, seq=8, hidden=32.
    batch, seq, hidden = 2, 8, 32
    rows = batch * seq

    key = jax.random.PRNGKey(0)
    kx, kw, kb, kx2, kw2, kb2 = jax.random.split(key, 6)

    # Input arrives in bf16 (CastModule up-casts it to f32 in-kernel).
    x = jax.random.normal(kx, (rows, hidden), jnp.float32).astype(jnp.bfloat16)
    bound = 1.0 / (hidden ** 0.5)
    w = jax.random.uniform(kw, (hidden, hidden), jnp.float32, -bound, bound)
    b = jax.random.uniform(kb, (hidden,), jnp.float32, -bound, bound)

    # Strict CastModule semantics: in_cast=f32, out_cast=bf16.
    out = jax.block_until_ready(cast_linear(x, w, b))
    ref = (x.astype(jnp.float32) @ w + b).astype(jnp.bfloat16)
    assert out.shape == (rows, hidden) and out.dtype == jnp.bfloat16
    assert jnp.allclose(out.astype(jnp.float32), ref.astype(jnp.float32),
                        atol=1e-2, rtol=1e-2)

    # Medium, unaligned shape to exercise the multi-tile grid + padding path.
    R2, K2, N2 = 384, 384, 640
    x2 = jax.random.normal(kx2, (R2, K2), jnp.float32).astype(jnp.bfloat16)
    w2 = jax.random.normal(kw2, (K2, N2), jnp.float32) * 0.02
    b2 = jax.random.normal(kb2, (N2,), jnp.float32) * 0.02
    out2 = jax.block_until_ready(cast_linear(x2, w2, b2))
    ref2 = (x2.astype(jnp.float32) @ w2 + b2).astype(jnp.bfloat16)
    assert out2.shape == (R2, N2) and out2.dtype == jnp.bfloat16
    assert jnp.allclose(out2.astype(jnp.float32), ref2.astype(jnp.float32),
                        atol=2e-2, rtol=2e-2)

    print("KERNEL_OK")
</pallas_src>

<mosaic_0001>
module attributes {stable_mosaic.version = 11 : i64} {
  func.func @kernel(%arg0: i32, %arg1: i32, %arg2: i32, %arg3: memref<16x128xbf16, #tpu.memory_space<vmem>>, %arg4: memref<128x128xf32, #tpu.memory_space<vmem>>, %arg5: memref<1x128xf32, #tpu.memory_space<vmem>>, %arg6: memref<16x128xbf16, #tpu.memory_space<vmem>>, %arg7: memref<16x128xf32, #tpu.memory_space<vmem>>) attributes {dimension_semantics = [#tpu.dimension_semantics<parallel>, #tpu.dimension_semantics<parallel>, #tpu.dimension_semantics<arbitrary>], iteration_bounds = array<i64: 1, 1, 1>, scalar_prefetch = 0 : i64, scratch_operands = 1 : i64, tpu.core_type = #tpu.core_type<tc>, window_params = [{transform_indices = @transform_0, window_bounds = array<i64: 16, 128>}, {transform_indices = @transform_1, window_bounds = array<i64: 128, 128>}, {transform_indices = @transform_2, window_bounds = array<i64: 1, 128>}, {transform_indices = @transform_3, window_bounds = array<i64: 16, 128>}]} {
    %c0_i32 = arith.constant 0 : i32
    %0 = arith.cmpi eq, %arg2, %c0_i32 : i32
    %1 = arith.extui %0 : i1 to i32
    %c0_i32_0 = arith.constant 0 : i32
    %2 = arith.cmpi ne, %1, %c0_i32_0 : i32
    scf.if %2 {
      %cst_10 = arith.constant 0.000000e+00 : f32
      %13 = vector.broadcast %cst_10 : f32 to vector<16x128xf32>
      %c0_11 = arith.constant 0 : index
      %c0_12 = arith.constant 0 : index
      %14 = vector.load %arg7[%c0_11, %c0_12] : memref<16x128xf32, #tpu.memory_space<vmem>>, vector<16x128xf32>
      tpu.vector_store %arg7[%c0_11, %c0_12], %13 {strides = array<i32>} : memref<16x128xf32, #tpu.memory_space<vmem>>, vector<16x128xf32>,
    } else {
    }
    %c0 = arith.constant 0 : index
    %c0_1 = arith.constant 0 : index
    %3 = vector.load %arg3[%c0, %c0_1] : memref<16x128xbf16, #tpu.memory_space<vmem>>, vector<16x128xbf16>
    %4 = arith.extf %3 : vector<16x128xbf16> to vector<16x128xf32>
    %c0_2 = arith.constant 0 : index
    %c0_3 = arith.constant 0 : index
    %5 = vector.load %arg4[%c0_2, %c0_3] : memref<128x128xf32, #tpu.memory_space<vmem>>, vector<128x128xf32>
    %c0_4 = arith.constant 0 : index
    %c0_5 = arith.constant 0 : index
    %6 = vector.load %arg7[%c0_4, %c0_5] : memref<16x128xf32, #tpu.memory_space<vmem>>, vector<16x128xf32>
    %cst = arith.constant dense<0.000000e+00> : vector<16x128xf32>
    %7 = tpu.matmul %4, %5, %cst {dimension_numbers = #tpu.dot_dimension_numbers<[1], [0], [0], [1], [0, 0, 1, 1], [], []>} : vector<16x128xf32>, vector<128x128xf32>, vector<16x128xf32> -> vector<16x128xf32>
    %8 = arith.addf %6, %7 : vector<16x128xf32>
    %c0_6 = arith.constant 0 : index
    %c0_7 = arith.constant 0 : index
    %9 = vector.load %arg7[%c0_6, %c0_7] : memref<16x128xf32, #tpu.memory_space<vmem>>, vector<16x128xf32>
    tpu.vector_store %arg7[%c0_6, %c0_7], %8 {strides = array<i32>} : memref<16x128xf32, #tpu.memory_space<vmem>>, vector<16x128xf32>,
    %c0_i32_8 = arith.constant 0 : i32
    %10 = arith.cmpi eq, %arg2, %c0_i32_8 : i32
    %11 = arith.extui %10 : i1 to i32
    %c0_i32_9 = arith.constant 0 : i32
    %12 = arith.cmpi ne, %11, %c0_i32_9 : i32
    scf.if %12 {
      %c0_10 = arith.constant 0 : index
      %c0_11 = arith.constant 0 : index
      %13 = vector.load %arg7[%c0_10, %c0_11] : memref<16x128xf32, #tpu.memory_space<vmem>>, vector<16x128xf32>
      %c0_12 = arith.constant 0 : index
      %c0_13 = arith.constant 0 : index
      %14 = vector.load %arg5[%c0_12, %c0_13] : memref<1x128xf32, #tpu.memory_space<vmem>>, vector<1x128xf32>
      %15 = vector.broadcast %14 : vector<1x128xf32> to vector<16x128xf32>
      %16 = arith.addf %13, %15 : vector<16x128xf32>
      %17 = arith.truncf %16 : vector<16x128xf32> to vector<16x128xbf16>
      %c0_14 = arith.constant 0 : index
      %c0_15 = arith.constant 0 : index
      %18 = vector.load %arg6[%c0_14, %c0_15] : memref<16x128xbf16, #tpu.memory_space<vmem>>, vector<16x128xbf16>
      tpu.vector_store %arg6[%c0_14, %c0_15], %17 {strides = array<i32>} : memref<16x128xbf16, #tpu.memory_space<vmem>>, vector<16x128xbf16>,
    } else {
    }
    return
  }
  func.func @transform_0(%arg0: i32, %arg1: i32, %arg2: i32) -> (i32, i32) {
    %c0_i32 = arith.constant 0 : i32
    return %arg0, %arg2 : i32, i32
  }
  func.func @transform_1(%arg0: i32, %arg1: i32, %arg2: i32) -> (i32, i32) {
    %c0_i32 = arith.constant 0 : i32
    return %arg2, %arg1 : i32, i32
  }
  func.func @transform_2(%arg0: i32, %arg1: i32, %arg2: i32) -> (i32, i32) {
    %c0_i32 = arith.constant 0 : i32
    %c0_i32_0 = arith.constant 0 : i32
    return %c0_i32, %arg1 : i32, i32
  }
  func.func @transform_3(%arg0: i32, %arg1: i32, %arg2: i32) -> (i32, i32) {
    %c0_i32 = arith.constant 0 : i32
    return %arg0, %arg1 : i32, i32
  }
}

</mosaic_0001>

<bundles_post_ra>
// kernel: tpu_custom_call.1
= control target key start
LH: loop header
LB: loop body
LE: loop exit
PB: predicated region body
PF: predicated region fallthrough
CT: control target
= control target key end

     0   :  { %8 = vsyncpa [#allocation4], 0  ;;  %s442_s0 = inlined_call_operand.hbm [shape: bf16[16,128], index: 0, kind: input, shape index: {}]   ;;  %s443_s1 = inlined_call_operand.hbm [shape: f32[128,128], index: 1, kind: input, shape index: {}]   ;;  %s444_s2 = inlined_call_operand.vmem [shape: f32[1,128], index: 2, kind: input, shape index: {}]   ;;  %s445_s3 = inlined_call_operand.hbm [shape: bf16[16,128], index: 3, kind: output, shape index: {}]  }
   0x1   :  { %9 = vsyncpa [#allocation7], 0 }
   0x2   :  { %10 = vsyncpa [#allocation5], 0  ;;  %s370_s12 = smov [#allocation3]   ;;  %s298_s16 = scalar_lea.hbm %s442_s0, 128 }
   0x3   :  { %s16_s13 = sshll.u32 %s370_s12, 4  ;;  %p299_p0 = scmp.ne.s32.totalorder %s442_s0, %s298_s16  ;;  %s17_s13 = int_to_ptr.vmem [resolvable:$true] %s16_s13 }
   0x4   :  { %p302_p1 = scmp.lt.u32.totalorder %s298_s16, %s442_s0 }
   0x6   :  { %p304_p2 = pnand %p302_p1, %p299_p0 }
   0x8   :  { %307 = shalt.err (!%p304_p2)
}
   0x9   :  { %s308_s21 = scalar_lea.vmem %s17_s13, 128  ;;  %p313_p4 = scmp.lt.s32.totalorder %s17_s13, %s17_s13 }
   0xa   :  { %p309_p3 = scmp.ne.s32.totalorder %s17_s13, %s308_s21  ;;  %p314_p5 = scmp.lt.s32.totalorder %s308_s21, %s308_s21 }
   0xc   :  { %p315_p6 = por %p314_p5, %p313_p4 }
   0xe   :  { %p316_p7 = pnand %p315_p6, %p309_p3 }
  0x10   :  { %319 = shalt.err (!%p316_p7)
}
  0x11   :  { %s371_s22 = smov 64   ;;  %s372_s23 = smov 4  }
  0x12   :  { %22 = dma.hbm_to_vmem [thread:$0]  %s442_s0, 128, %s17_s13, [#allocation4], %s371_s22, %s371_s22, %s372_s23  }
  0x13   :  { %s373_s26 = smov [#allocation6]   ;;  %s320_s30 = scalar_lea.hbm %s443_s1, 2048 }
  0x14   :  { %s28_s27 = sshll.u32 %s373_s26, 4  ;;  %p321_p8 = scmp.ne.s32.totalorder %s443_s1, %s320_s30  ;;  %s29_s27 = int_to_ptr.vmem [resolvable:$true] %s28_s27 }
  0x15   :  { %p324_p9 = scmp.lt.u32.totalorder %s320_s30, %s443_s1 }
  0x17   :  { %p326_p10 = pnand %p324_p9, %p321_p8 }
  0x19   :  { %329 = shalt.err (!%p326_p10)
}
  0x1a   :  { %s330_s8 = scalar_lea.vmem %s29_s27, 2048  ;;  %p335_p12 = scmp.lt.s32.totalorder %s29_s27, %s29_s27 }
  0x1b   :  { %p331_p11 = scmp.ne.s32.totalorder %s29_s27, %s330_s8  ;;  %p336_p13 = scmp.lt.s32.totalorder %s330_s8, %s330_s8 }
  0x1d   :  { %p337_p0 = por %p336_p13, %p335_p12 }
  0x1f   :  { %p338_p1 = pnand %p337_p0, %p331_p11 }
  0x21   :  { %341 = shalt.err (!%p338_p1)
}
  0x22   :  { %s374_s0 = smov 128   ;;  %s375_s9 = smov 8  }
  0x23   :  { %34 = dma.hbm_to_vmem [thread:$0]  %s443_s1, 2048, %s29_s27, [#allocation7], %s374_s0, %s374_s0, %s375_s9  }
  0x24   :  { %364 = dma.done.wait [#allocation4], 128  }
  0x25   :  { %365 = vsyncadd [#allocation4], 4294967168 }
  0x26   :  { %366 = dma.done.wait [#allocation7], 2048  }
  0x27   :  { %367 = vsyncadd [#allocation7], 4294965248  ;;  %v53_v0 = vld [vmem:[#allocation6] sm:$0xff]  ;;  %v54_v1 = vld [vmem:[#allocation6 + $0x8] sm:$0xff]  ;;  %s376_s13 = smov [#allocation8]  }
  0x28   :  { %v55_v2 = vld [vmem:[#allocation6 + $0x10] sm:$0xff]  ;;  %v259_v3 = vpack.c.bf16 %v54_v1, %v53_v0  ;;  %v56_v4 = vld [vmem:[#allocation6 + $0x18] sm:$0xff]  ;;  %v57_v6 = vld [vmem:[#allocation6 + $0x20] sm:$0xff]  ;;  %s179_s14 = sshll.u32 %s376_s13, 4  ;;  %s180_s14 = int_to_ptr.vmem [resolvable:$true] %s179_s14 }
  0x29   :  { %v263_v5 = vpack.c.bf16 %v56_v4, %v55_v2  ;;  %v58_v7 = vld [vmem:[#allocation6 + $0x28] sm:$0xff]  ;;  %v198_v9 = vld [vmem:[#allocation3] sm:$0xff]   ;;  %v59_v10 = vld [vmem:[#allocation6 + $0x30] sm:$0xff]  ;;  %s342_s15 = scalar_lea.vmem %s180_s14, 128  ;;  %p347_p3 = scmp.lt.s32.totalorder %s180_s14, %s180_s14 }
  0x2a   :  { %260 = vmatprep.subr.bf16.mxu0 %v259_v3  ;;  %v267_v8 = vpack.c.bf16 %v58_v7, %v57_v6  ;;  %v60_v11 = vld [vmem:[#allocation6 + $0x38] sm:$0xff]  ;;  %v199_v12 = vunpack.c.l.bf16 %v198_v9  ;;  %v61_v14 = vld [vmem:[#allocation6 + $0x40] sm:$0xff]  ;;  %v62_v15 = vld [vmem:[#allocation6 + $0x48] sm:$0xff]  ;;  %v200_v26 = vunpack.c.h.bf16 %v198_v9  ;;  %p343_p2 = scmp.ne.s32.totalorder %s180_s14, %s342_s15  ;;  %p348_p4 = scmp.lt.s32.totalorder %s342_s15, %s342_s15 }
  0x2b   :  { %262 = vmatpush3.bf16.msra.mxu0 %v259_v3  ;;  %v271_v13 = vpack.c.bf16 %v60_v11, %v59_v10  ;;  %v275_v16 = vpack.c.bf16 %v62_v15, %v61_v14  ;;  %v63_v17 = vld [vmem:[#allocation6 + $0x50] sm:$0xff]  ;;  %v64_v18 = vld [vmem:[#allocation6 + $0x58] sm:$0xff]  ;;  %v65_v20 = vld [vmem:[#allocation6 + $0x60] sm:$0xff] }
  0x2c   :  { %264 = vmatprep.subr.bf16.mxu0 %v263_v5  ;;  %256 = vmatprep.mubr.f32.mxu0 %v199_v12  ;;  %v279_v19 = vpack.c.bf16 %v64_v18, %v63_v17  ;;  %v66_v21 = vld [vmem:[#allocation6 + $0x68] sm:$0xff]  ;;  %v67_v23 = vld [vmem:[#allocation6 + $0x70] sm:$0xff]  ;;  %v68_v24 = vld [vmem:[#allocation6 + $0x78] sm:$0xff]  ;;  %p349_p5 = por %p348_p4, %p347_p3 }
  0x2d   :  { %v283_v22 = vpack.c.bf16 %v66_v21, %v65_v20  ;;  %v287_v25 = vpack.c.bf16 %v68_v24, %v67_v23  ;;  %v192_v27 = vld [vmem:[%s444_s2] ss:$0 sm:$0xff] }
  0x2e   :  { %p350_p6 = pnand %p349_p5, %p343_p2 }
  0x2f   :  { %266 = vmatpush3.bf16.msra.mxu0 %v263_v5 }
  0x30   :  { %268 = vmatprep.subr.bf16.mxu0 %v267_v8 }
  0x33   :  { %270 = vmatpush3.bf16.msra.mxu0 %v267_v8 }
  0x34   :  { %272 = vmatprep.subr.bf16.mxu0 %v271_v13 }
  0x37   :  { %274 = vmatpush3.bf16.msra.mxu0 %v271_v13 }
  0x38   :  { %276 = vmatprep.subr.bf16.mxu0 %v275_v16 }
  0x3b   :  { %278 = vmatpush3.bf16.msra.mxu0 %v275_v16 }
  0x3c   :  { %280 = vmatprep.subr.bf16.mxu0 %v279_v19 }
  0x3f   :  { %282 = vmatpush3.bf16.msra.mxu0 %v279_v19 }
  0x40   :  { %284 = vmatprep.subr.bf16.mxu0 %v283_v22 }
  0x43   :  { %286 = vmatpush3.bf16.msra.mxu0 %v283_v22 }
  0x44   :  { %288 = vmatprep.subr.bf16.mxu0 %v287_v25 }
  0x47   :  { %290 = vmatpush3.bf16.msra.mxu0 %v287_v25 }
  0x4a   :  { %257 = vmatmul.mubr.f32.vlgmr.msra.gmra.mrb[0].mxu0 %v200_v26 }
 0x11d   :  { %v258_v28 = vpop.f32.mrb[0].mxu0 }
 0x11e   :  { %v163_v29 = vadd.f32 %v258_v28, %v192_v27  ;;  %v137_v30 = vpop.f32.mrb[1].mxu0 }
 0x11f   :  { %v162_v31 = vadd.f32 %v192_v27, %v137_v30 }
 0x121   :  { %v204_v32 = vpack.c.bf16 %v163_v29, %v162_v31 }
 0x123   :  { %205 = vst [vmem:[#allocation8] sm:$0xff] %v204_v32  }
 0x124   :  { %353 = shalt.err (!%p350_p6)
}
 0x125   :  { %s354_s2 = scalar_lea.hbm %s445_s3, 128 }
 0x126   :  { %p355_p7 = scmp.ne.s32.totalorder %s445_s3, %s354_s2  ;;  %p358_p8 = scmp.lt.u32.totalorder %s354_s2, %s445_s3 }
 0x128   :  { %p360_p9 = pnand %p358_p8, %p355_p7 }
 0x12a   :  { %363 = shalt.err (!%p360_p9)
}
 0x12b   :  { %185 = dma.vmem_to_hbm [thread:$0]  %s180_s14, 128, %s445_s3, [#allocation5], %s371_s22, %s371_s22, %s372_s23  }
 0x12c   :  { %368 = dma.done.wait [#allocation5], 128  }
 0x12d   :  { %369 = vsyncadd [#allocation5], 4294967168 }
 0x12e   :  { %189 = vsyncpa [#allocation4], 1 }
 0x12f   :  { %190 = vsyncpa [#allocation7], 1 }
 0x130   :  { %191 = vsyncpa [#allocation5], 1 }

</bundles_post_ra>
